<compile_context>
chip_gen: v5e
topology: v5e:2x2
jax: 0.10.0
libtpu: 0.0.40
codegen_flags: <defaults>
</compile_context>

<pallas_src>
import jax
import jax.numpy as jnp
from jax.experimental import pallas as pl
from jax.experimental.pallas import tpu as pltpu

LANE = 128          # TPU lane width; all padded dims are multiples of this.
MAX_TILE_N = 512    # row-tile upper bound (amortizes per-grid-step overhead)
MAX_TILE_K = 512    # adjacency-contraction chunk (keeps VMEM small on v7x)


def _round_up(x, m):
    return ((x + m - 1) // m) * m


def _pad2d(x, rows, cols):
    x = jnp.asarray(x, jnp.float32)
    return jnp.pad(x, ((0, rows - x.shape[0]), (0, cols - x.shape[1])))


def _choose_tiling(n):
    """Pick (tile_n, tile_k, n_pad) such that tile_n | n_pad and tile_k | n_pad."""
    n128 = _round_up(max(n, 1), LANE)
    tile_n = min(MAX_TILE_N, n128)
    n_pad = _round_up(n, tile_n)
    tile_k = min(MAX_TILE_K, n_pad)
    return tile_n, tile_k, n_pad


# ---------------------------------------------------------------------------
# Kernel 1: feature transform  XW = X @ W   (bf16 operands, f32 accumulate)
# Computed once; consumed by the aggregation kernel below.
# ---------------------------------------------------------------------------
def _xw_kernel(x_ref, w_ref, o_ref):
    o_ref[...] = jnp.dot(
        x_ref[...], w_ref[...], preferred_element_type=jnp.float32
    ).astype(o_ref.dtype)


def _feature_transform(x_bf, w_bf, tile_n):
    n_pad, f_in = x_bf.shape
    f_out = w_bf.shape[1]
    return pl.pallas_call(
        _xw_kernel,
        out_shape=jax.ShapeDtypeStruct((n_pad, f_out), jnp.bfloat16),
        grid_spec=pltpu.PrefetchScalarGridSpec(
            num_scalar_prefetch=0,
            grid=(n_pad // tile_n,),
            in_specs=[
                pl.BlockSpec((tile_n, f_in), lambda i: (i, 0)),
                pl.BlockSpec((f_in, f_out), lambda i: (0, 0)),
            ],
            out_specs=pl.BlockSpec((tile_n, f_out), lambda i: (i, 0)),
        ),
        compiler_params=pltpu.CompilerParams(dimension_semantics=("parallel",)),
        cost_estimate=pl.CostEstimate(
            flops=2 * n_pad * f_in * f_out,
            transcendentals=0,
            bytes_accessed=2 * (n_pad * f_in + f_in * f_out + n_pad * f_out),
        ),
    )(x_bf, w_bf)


# ---------------------------------------------------------------------------
# Kernel 2 (fused): H = relu(A @ XW1 + b1);  HW2 = H @ W2
# Grid = (row tiles, adjacency-K chunks). The layer-1 bias is folded into the
# f32 accumulator init; the hidden activation H never leaves VMEM.
# ---------------------------------------------------------------------------
def _agg_relu_xw_kernel(a_ref, xw_ref, b_ref, w2_ref, o_ref, acc_ref):
    k = pl.program_id(1)

    @pl.when(k == 0)
    def _():
        acc_ref[...] = jnp.broadcast_to(b_ref[...], acc_ref.shape)

    acc_ref[...] += jnp.dot(
        a_ref[...], xw_ref[...], preferred_element_type=jnp.float32
    )

    @pl.when(k == pl.num_programs(1) - 1)
    def _():
        h = jnp.maximum(acc_ref[...], 0.0).astype(w2_ref.dtype)
        o_ref[...] = jnp.dot(
            h, w2_ref[...], preferred_element_type=jnp.float32
        ).astype(o_ref.dtype)


def _aggregate_relu_transform(a_bf, xw1_bf, b1, w2_bf, tile_n, tile_k):
    n_pad = a_bf.shape[0]
    h_dim = xw1_bf.shape[1]
    c_dim = w2_bf.shape[1]
    return pl.pallas_call(
        _agg_relu_xw_kernel,
        out_shape=jax.ShapeDtypeStruct((n_pad, c_dim), jnp.bfloat16),
        grid_spec=pltpu.PrefetchScalarGridSpec(
            num_scalar_prefetch=0,
            grid=(n_pad // tile_n, n_pad // tile_k),
            in_specs=[
                pl.BlockSpec((tile_n, tile_k), lambda i, k: (i, k)),
                pl.BlockSpec((tile_k, h_dim), lambda i, k: (k, 0)),
                pl.BlockSpec((1, h_dim), lambda i, k: (0, 0)),
                pl.BlockSpec((h_dim, c_dim), lambda i, k: (0, 0)),
            ],
            out_specs=pl.BlockSpec((tile_n, c_dim), lambda i, k: (i, 0)),
            scratch_shapes=[pltpu.VMEM((tile_n, h_dim), jnp.float32)],
        ),
        compiler_params=pltpu.CompilerParams(
            dimension_semantics=("parallel", "arbitrary")
        ),
        cost_estimate=pl.CostEstimate(
            flops=2 * n_pad * n_pad * h_dim + 2 * n_pad * h_dim * c_dim,
            transcendentals=0,
            bytes_accessed=2 * (n_pad * n_pad + n_pad * h_dim
                                + h_dim * c_dim + n_pad * c_dim),
        ),
    )(a_bf, xw1_bf, b1, w2_bf)


# ---------------------------------------------------------------------------
# Kernel 3: OUT = A @ HW2 + b2   (f32 output), same K-tiled accumulator scheme.
# ---------------------------------------------------------------------------
def _agg_bias_kernel(a_ref, m_ref, b_ref, o_ref, acc_ref):
    k = pl.program_id(1)

    @pl.when(k == 0)
    def _():
        acc_ref[...] = jnp.broadcast_to(b_ref[...], acc_ref.shape)

    acc_ref[...] += jnp.dot(
        a_ref[...], m_ref[...], preferred_element_type=jnp.float32
    )

    @pl.when(k == pl.num_programs(1) - 1)
    def _():
        o_ref[...] = acc_ref[...].astype(o_ref.dtype)


def _aggregate_bias(a_bf, m_bf, b, tile_n, tile_k):
    n_pad = a_bf.shape[0]
    c_dim = m_bf.shape[1]
    return pl.pallas_call(
        _agg_bias_kernel,
        out_shape=jax.ShapeDtypeStruct((n_pad, c_dim), jnp.float32),
        grid_spec=pltpu.PrefetchScalarGridSpec(
            num_scalar_prefetch=0,
            grid=(n_pad // tile_n, n_pad // tile_k),
            in_specs=[
                pl.BlockSpec((tile_n, tile_k), lambda i, k: (i, k)),
                pl.BlockSpec((tile_k, c_dim), lambda i, k: (k, 0)),
                pl.BlockSpec((1, c_dim), lambda i, k: (0, 0)),
            ],
            out_specs=pl.BlockSpec((tile_n, c_dim), lambda i, k: (i, 0)),
            scratch_shapes=[pltpu.VMEM((tile_n, c_dim), jnp.float32)],
        ),
        compiler_params=pltpu.CompilerParams(
            dimension_semantics=("parallel", "arbitrary")
        ),
        cost_estimate=pl.CostEstimate(
            flops=2 * n_pad * n_pad * c_dim,
            transcendentals=0,
            bytes_accessed=2 * (n_pad * n_pad + 2 * n_pad * c_dim)
                           + 4 * n_pad * c_dim,
        ),
    )(a_bf, m_bf, b)


def gcn_model_forward(a_norm, node_embeddings, edge_encodings, params):
    """Pallas implementation of GCNModel.forward.

    edge_encodings is unused (matches the reference module, where GraphConv
    does not consume it)."""
    del edge_encodings
    n, f_in = node_embeddings.shape
    h_dim = params["w1"].shape[1]
    c_dim = params["w2"].shape[1]

    tile_n, tile_k, n_pad = _choose_tiling(n)
    f_in_p = _round_up(f_in, LANE)
    h_p = _round_up(h_dim, LANE)
    c_p = _round_up(c_dim, LANE)

    # Cast the big MXU operands to bf16 once (f32 accumulation keeps the
    # reductions accurate); biases stay f32. Everything is zero-padded to
    # lane-dense multiples of 128 so no masked stores are emitted.
    a_bf = _pad2d(a_norm, n_pad, n_pad).astype(jnp.bfloat16)
    x_bf = _pad2d(node_embeddings, n_pad, f_in_p).astype(jnp.bfloat16)
    w1_bf = _pad2d(params["w1"], f_in_p, h_p).astype(jnp.bfloat16)
    w2_bf = _pad2d(params["w2"], h_p, c_p).astype(jnp.bfloat16)
    b1 = _pad2d(params["b1"].reshape(1, -1), 1, h_p)
    b2 = _pad2d(params["b2"].reshape(1, -1), 1, c_p)

    xw1 = _feature_transform(x_bf, w1_bf, tile_n)                          # (n_pad, h_p) bf16
    hw2 = _aggregate_relu_transform(a_bf, xw1, b1, w2_bf, tile_n, tile_k)  # (n_pad, c_p) bf16
    out = _aggregate_bias(a_bf, hw2, b2, tile_n, tile_k)                   # (n_pad, c_p) f32
    return out[:n, :c_dim]


# ---------------------------------------------------------------------------
# Test harness
# ---------------------------------------------------------------------------
def _xavier_uniform(key, shape):
    fan_in, fan_out = shape
    limit = jnp.sqrt(6.0 / (fan_in + fan_out))
    return jax.random.uniform(key, shape, jnp.float32, -limit, limit)


def _init_params(key, in_feats, hidden_feats, num_classes):
    k1, k2 = jax.random.split(key)
    return {
        # DGL GraphConv: weight ~ xavier_uniform, bias = zeros
        "w1": _xavier_uniform(k1, (in_feats, hidden_feats)),
        "b1": jnp.zeros((hidden_feats,), jnp.float32),
        "w2": _xavier_uniform(k2, (hidden_feats, num_classes)),
        "b2": jnp.zeros((num_classes,), jnp.float32),
    }


def _build_normalized_adjacency(key, n):
    # Deterministic synthetic graph: sparse random symmetric adjacency + self
    # loops (avoids zero-degree nodes), then symmetric 'both' normalization.
    upper = jax.random.bernoulli(key, p=0.1, shape=(n, n)).astype(jnp.float32)
    upper = jnp.triu(upper, k=1)
    adj = upper + upper.T + jnp.eye(n, dtype=jnp.float32)
    deg = adj.sum(axis=1)
    d_inv_sqrt = 1.0 / jnp.sqrt(deg)
    return d_inv_sqrt[:, None] * adj * d_inv_sqrt[None, :]


def _reference_forward(a_norm, x, params):
    h = a_norm @ (x @ params["w1"]) + params["b1"][None, :]
    h = jnp.maximum(h, 0.0)
    h = a_norm @ (h @ params["w2"]) + params["b2"][None, :]
    return h


if __name__ == "__main__":
    N = 64            # number of graph nodes
    IN_FEATS = 32
    HIDDEN_FEATS = 32
    NUM_CLASSES = 16

    key = jax.random.PRNGKey(0)
    k_graph, k_feat, k_edge, k_param = jax.random.split(key, 4)

    a_norm = _build_normalized_adjacency(k_graph, N)
    node_embeddings = jax.random.normal(k_feat, (N, IN_FEATS), jnp.float32)
    # Dummy edge encodings (unused by the forward pass, kept for signature parity).
    edge_encodings = jax.random.normal(k_edge, (N, N, 4), jnp.float32)

    params = _init_params(k_param, IN_FEATS, HIDDEN_FEATS, NUM_CLASSES)

    out = gcn_model_forward(a_norm, node_embeddings, edge_encodings, params)
    out = jax.block_until_ready(out)

    ref = _reference_forward(a_norm, node_embeddings, params)
    assert out.shape == (N, NUM_CLASSES)
    # bf16 MXU operands with f32 accumulation: ~1% quantization vs. the f32
    # reference is expected — not a bug.
    assert jnp.allclose(out, ref, atol=2e-2, rtol=2e-2), "mismatch vs reference"

    print("KERNEL_OK")
</pallas_src>

<mosaic_0001>
module attributes {stable_mosaic.version = 11 : i64} {
  func.func @_xw_kernel(%arg0: i32, %arg1: memref<128x128xbf16, #tpu.memory_space<vmem>>, %arg2: memref<128x128xbf16, #tpu.memory_space<vmem>>, %arg3: memref<128x128xbf16, #tpu.memory_space<vmem>>) attributes {dimension_semantics = [#tpu.dimension_semantics<parallel>], iteration_bounds = array<i64: 1>, scalar_prefetch = 0 : i64, scratch_operands = 0 : i64, tpu.core_type = #tpu.core_type<tc>, window_params = [{transform_indices = @transform_0, window_bounds = array<i64: 128, 128>}, {pipeline_mode = #tpu.pipeline_mode<synchronous>, transform_indices = @transform_1, window_bounds = array<i64: 128, 128>}, {transform_indices = @transform_2, window_bounds = array<i64: 128, 128>}]} {
    %c0 = arith.constant 0 : index
    %c0_0 = arith.constant 0 : index
    %0 = vector.load %arg1[%c0, %c0_0] : memref<128x128xbf16, #tpu.memory_space<vmem>>, vector<128x128xbf16>
    %c0_1 = arith.constant 0 : index
    %c0_2 = arith.constant 0 : index
    %1 = vector.load %arg2[%c0_1, %c0_2] : memref<128x128xbf16, #tpu.memory_space<vmem>>, vector<128x128xbf16>
    %cst = arith.constant dense<0.000000e+00> : vector<128x128xf32>
    %2 = tpu.matmul %0, %1, %cst {dimension_numbers = #tpu.dot_dimension_numbers<[1], [0], [0], [1], [0, 0, 1, 1], [], []>} : vector<128x128xbf16>, vector<128x128xbf16>, vector<128x128xf32> -> vector<128x128xf32>
    %3 = arith.truncf %2 : vector<128x128xf32> to vector<128x128xbf16>
    %c0_3 = arith.constant 0 : index
    %c0_4 = arith.constant 0 : index
    %4 = vector.load %arg3[%c0_3, %c0_4] : memref<128x128xbf16, #tpu.memory_space<vmem>>, vector<128x128xbf16>
    tpu.vector_store %arg3[%c0_3, %c0_4], %3 {strides = array<i32>} : memref<128x128xbf16, #tpu.memory_space<vmem>>, vector<128x128xbf16>,
    return
  }
  func.func @transform_0(%arg0: i32) -> (i32, i32) {
    %c0_i32 = arith.constant 0 : i32
    %c0_i32_0 = arith.constant 0 : i32
    return %arg0, %c0_i32 : i32, i32
  }
  func.func @transform_1(%arg0: i32) -> (i32, i32) {
    %c0_i32 = arith.constant 0 : i32
    %c0_i32_0 = arith.constant 0 : i32
    %c0_i32_1 = arith.constant 0 : i32
    return %c0_i32, %c0_i32_0 : i32, i32
  }
  func.func @transform_2(%arg0: i32) -> (i32, i32) {
    %c0_i32 = arith.constant 0 : i32
    %c0_i32_0 = arith.constant 0 : i32
    return %arg0, %c0_i32 : i32, i32
  }
}

</mosaic_0001>

<bundles_post_ra>
// kernel: tpu_custom_call.1
= control target key start
LH: loop header
LB: loop body
LE: loop exit
PB: predicated region body
PF: predicated region fallthrough
CT: control target
= control target key end

     0   :  { %7 = vsyncpa [#allocation3], 0  ;;  %s545_s0 = inlined_call_operand.hbm [shape: bf16[128,128], index: 0, kind: input, shape index: {}]   ;;  %s546_s1 = inlined_call_operand.hbm [shape: bf16[128,128], index: 1, kind: input, shape index: {}]   ;;  %s547_s2 = inlined_call_operand.hbm [shape: bf16[128,128], index: 2, kind: output, shape index: {}]  }
   0x1   :  { %8 = vsyncpa [#allocation6], 0 }
   0x2   :  { %9 = vsyncpa [#allocation4], 0  ;;  %s14_s11 = sshll.u32 %s545_s0, 4  ;;  %s507_s12 = smov [#allocation2]   ;;  %s15_s11 = int_to_ptr.hbm [resolvable:$true] %s14_s11 }
   0x3   :  { %s16_s13 = sshll.u32 %s507_s12, 4  ;;  %s27_s16 = sshll.u32 %s546_s1, 4  ;;  %s17_s13 = int_to_ptr.vmem [resolvable:$true] %s16_s13  ;;  %s28_s16 = int_to_ptr.hbm [resolvable:$true] %s27_s16 }
   0x4   :  { %s508_s17 = smov 64   ;;  %s509_s18 = smov 4  }
   0x5   :  { %22 = dma.hbm_to_vmem [thread:$0]  %s15_s11, 1024, %s17_s13, [#allocation3], %s508_s17, %s508_s17, %s509_s18  }
   0x6   :  { %s510_s19 = smov [#allocation5]  }
   0x7   :  { %s29_s20 = sshll.u32 %s510_s19, 4  ;;  %s30_s20 = int_to_ptr.vmem [resolvable:$true] %s29_s20 }
   0x8   :  { %35 = dma.hbm_to_vmem [thread:$0]  %s28_s16, 1024, %s30_s20, [#allocation6], %s508_s17, %s508_s17, %s509_s18  }
   0x9   :  { %501 = dma.done.wait [#allocation3], 1024  }
   0xa   :  { %502 = vsyncadd [#allocation3], 4294966272 }
   0xb   :  { %503 = dma.done.wait [#allocation6], 1024  }
   0xc   :  { %504 = vsyncadd [#allocation6], 4294966272  ;;  %v352_v0 = vld [vmem:[#allocation5 + $0x38] sm:$0xff]  ;;  %v351_v1 = vld [vmem:[#allocation5 + $0x30] sm:$0xff]  ;;  %s511_s0 = smov [#allocation7]   ;;  %s259_s23 = sshll.u32 %s547_s2, 4  ;;  %s260_s23 = int_to_ptr.hbm [resolvable:$true] %s259_s23 }
   0xd   :  { %172 = vmatpush.bf16.msra.mxu0 %v352_v0  ;;  %400 = vmatpush.bf16.msra.mxu1 %v352_v0  ;;  %v350_v2 = vld [vmem:[#allocation5 + $0x28] sm:$0xff]  ;;  %v349_v3 = vld [vmem:[#allocation5 + $0x20] sm:$0xff]  ;;  %v348_v4 = vld [vmem:[#allocation5 + $0x18] sm:$0xff]  ;;  %s257_s1 = sshll.u32 %s511_s0, 4  ;;  %s258_s1 = int_to_ptr.vmem [resolvable:$true] %s257_s1 }
   0xe   :  { %401 = vmatpush.bf16.msra.mxu2 %v352_v0  ;;  %402 = vmatpush.bf16.msra.mxu3 %v352_v0  ;;  %v347_v5 = vld [vmem:[#allocation5 + $0x10] sm:$0xff]  ;;  %v346_v6 = vld [vmem:[#allocation5 + $0x8] sm:$0xff]  ;;  %v345_v7 = vld [vmem:[#allocation5] sm:$0xff] }
   0xf   :  { %v337_v8 = vld [vmem:[#allocation2] sm:$0xff]  ;;  %v339_v9 = vld [vmem:[#allocation2 + $0x10] sm:$0xff]  ;;  %v338_v12 = vld [vmem:[#allocation2 + $0x8] sm:$0xff] }
  0x10   :  { %v341_v10 = vld [vmem:[#allocation2 + $0x20] sm:$0xff]  ;;  %v343_v11 = vld [vmem:[#allocation2 + $0x30] sm:$0xff]  ;;  %v340_v13 = vld [vmem:[#allocation2 + $0x18] sm:$0xff] }
  0x11   :  { %173 = vmatpush.bf16.msra.mxu0 %v351_v1  ;;  %403 = vmatpush.bf16.msra.mxu1 %v351_v1  ;;  %v342_v14 = vld [vmem:[#allocation2 + $0x28] sm:$0xff]  ;;  %v344_v15 = vld [vmem:[#allocation2 + $0x38] sm:$0xff] }
  0x12   :  { %404 = vmatpush.bf16.msra.mxu2 %v351_v1  ;;  %405 = vmatpush.bf16.msra.mxu3 %v351_v1 }
  0x15   :  { %174 = vmatpush.bf16.msra.mxu0 %v350_v2  ;;  %406 = vmatpush.bf16.msra.mxu1 %v350_v2 }
  0x16   :  { %407 = vmatpush.bf16.msra.mxu2 %v350_v2  ;;  %408 = vmatpush.bf16.msra.mxu3 %v350_v2 }
  0x19   :  { %175 = vmatpush.bf16.msra.mxu0 %v349_v3  ;;  %409 = vmatpush.bf16.msra.mxu1 %v349_v3 }
  0x1a   :  { %410 = vmatpush.bf16.msra.mxu2 %v349_v3  ;;  %411 = vmatpush.bf16.msra.mxu3 %v349_v3 }
  0x1d   :  { %176 = vmatpush.bf16.msra.mxu0 %v348_v4  ;;  %412 = vmatpush.bf16.msra.mxu1 %v348_v4 }
  0x1e   :  { %413 = vmatpush.bf16.msra.mxu2 %v348_v4  ;;  %414 = vmatpush.bf16.msra.mxu3 %v348_v4 }
  0x21   :  { %177 = vmatpush.bf16.msra.mxu0 %v347_v5  ;;  %415 = vmatpush.bf16.msra.mxu1 %v347_v5 }
  0x22   :  { %416 = vmatpush.bf16.msra.mxu2 %v347_v5  ;;  %417 = vmatpush.bf16.msra.mxu3 %v347_v5 }
  0x25   :  { %178 = vmatpush.bf16.msra.mxu0 %v346_v6  ;;  %418 = vmatpush.bf16.msra.mxu1 %v346_v6 }
  0x26   :  { %419 = vmatpush.bf16.msra.mxu2 %v346_v6  ;;  %420 = vmatpush.bf16.msra.mxu3 %v346_v6 }
  0x29   :  { %179 = vmatpush.bf16.msra.mxu0 %v345_v7  ;;  %421 = vmatpush.bf16.msra.mxu1 %v345_v7 }
  0x2a   :  { %422 = vmatpush.bf16.msra.mxu2 %v345_v7  ;;  %423 = vmatpush.bf16.msra.mxu3 %v345_v7 }
  0x2c   :  { %180 = vmatmul.bf16.vlgmr.msra.gmra.mxu0 %v337_v8  ;;  %190 = vmatmul.bf16.vlgmr.msra.gmra.mxu1 %v339_v9 }
  0x2d   :  { %200 = vmatmul.bf16.vlgmr.msra.gmra.mxu2 %v341_v10  ;;  %210 = vmatmul.bf16.vlgmr.msra.gmra.mxu3 %v343_v11 }
  0x3c   :  { %185 = vmatmul.bf16.gmra.mxu0 %v338_v12  ;;  %195 = vmatmul.bf16.gmra.mxu1 %v340_v13 }
  0x3d   :  { %205 = vmatmul.bf16.gmra.mxu2 %v342_v14  ;;  %215 = vmatmul.bf16.gmra.mxu3 %v344_v15 }
  0xa9   :  { %v181_v16 = vpop.f32.mrf.mxu0  ;;  %v191_v17 = vpop.f32.mrf.mxu1 }
  0xb0   :  { %v201_v18 = vpop.f32.mrf.mxu2  ;;  %v211_v19 = vpop.f32.mrf.mxu3 }
  0xb1   :  { %v183_v20 = vpop.f32.mrf.mxu0  ;;  %v193_v21 = vpop.f32.mrf.mxu1 }
  0xb2   :  { %v356_v22 = vpack.c.bf16 %v183_v20, %v181_v16  ;;  %v366_v23 = vpack.c.bf16 %v193_v21, %v191_v17 }
  0xb4   :  { %357 = vst [vmem:[#allocation7] sm:$0xff] %v356_v22  }
  0xb5   :  { %394 = vst [vmem:[#allocation7 + $0x10] sm:$0xff] %v366_v23  }
  0xb8   :  { %v203_v24 = vpop.f32.mrf.mxu2  ;;  %v213_v25 = vpop.f32.mrf.mxu3 }
  0xb9   :  { %v376_v26 = vpack.c.bf16 %v203_v24, %v201_v18  ;;  %v386_v27 = vpack.c.bf16 %v213_v25, %v211_v19  ;;  %v186_v28 = vpop.f32.mrf.mxu0  ;;  %v196_v29 = vpop.f32.mrf.mxu1 }
  0xbb   :  { %396 = vst [vmem:[#allocation7 + $0x20] sm:$0xff] %v376_v26  }
  0xbc   :  { %398 = vst [vmem:[#allocation7 + $0x30] sm:$0xff] %v386_v27  }
  0xc0   :  { %v206_v30 = vpop.f32.mrf.mxu2  ;;  %v216_v31 = vpop.f32.mrf.mxu3 }
  0xc1   :  { %v188_v32 = vpop.f32.mrf.mxu0  ;;  %v198_v33 = vpop.f32.mrf.mxu1 }
  0xc2   :  { %v361_v34 = vpack.c.bf16 %v188_v32, %v186_v28  ;;  %v371_v35 = vpack.c.bf16 %v198_v33, %v196_v29 }
  0xc4   :  { %393 = vst [vmem:[#allocation7 + $0x8] sm:$0xff] %v361_v34  }
  0xc5   :  { %395 = vst [vmem:[#allocation7 + $0x18] sm:$0xff] %v371_v35  }
  0xc8   :  { %v208_v36 = vpop.f32.mrf.mxu2  ;;  %v218_v37 = vpop.f32.mrf.mxu3 }
  0xc9   :  { %v381_v38 = vpack.c.bf16 %v208_v36, %v206_v30  ;;  %v391_v39 = vpack.c.bf16 %v218_v37, %v216_v31 }
  0xcb   :  { %397 = vst [vmem:[#allocation7 + $0x28] sm:$0xff] %v381_v38  }
  0xcc   :  { %399 = vst [vmem:[#allocation7 + $0x38] sm:$0xff] %v391_v39  }
  0xcd   :  { %265 = dma.vmem_to_hbm [thread:$0]  %s258_s1, 1024, %s260_s23, [#allocation4], %s508_s17, %s508_s17, %s509_s18  }
  0xce   :  { %505 = dma.done.wait [#allocation4], 1024  }
  0xcf   :  { %506 = vsyncadd [#allocation4], 4294966272 }
  0xd0   :  { %270 = vsyncpa [#allocation3], 1 }
  0xd1   :  { %271 = vsyncpa [#allocation6], 1 }
  0xd2   :  { %272 = vsyncpa [#allocation4], 1 }

</bundles_post_ra>
